<compile_context>
chip_gen: v7x
topology: tpu7x:2x2x1
jax: 0.10.0
libtpu: 0.0.40
codegen_flags: <defaults>
</compile_context>

<pallas_src>
import jax
import jax.numpy as jnp
from jax.experimental import pallas as pl
from jax.experimental.pallas import tpu as pltpu

BN_EPS = 1e-5
INTER_DTYPE = jnp.float32  # intermediate (y1/y2) storage dtype


# ----------------------------- in-kernel helpers -------------------------------------


def _zero_halo(pad_ref, hp, wp, c):
    """Zero only the 1-pixel halo of a (hp, wp, c) padded scratch buffer."""
    zrow = jnp.zeros((1, wp, c), jnp.float32)
    zcol = jnp.zeros((hp, 1, c), jnp.float32)
    pad_ref[0:1, :, :] = zrow
    pad_ref[hp - 1:hp, :, :] = zrow
    pad_ref[:, 0:1, :] = zcol
    pad_ref[:, wp - 1:wp, :] = zcol


def _conv3x3_im2col(pad_ref, w_ref, ho, wo, c):
    """3x3 'same' conv from an already padded (ho+2, wo+2, c) scratch via ONE fat matmul.

    im2col: 9 shifted views concatenated on the channel (lane) dim -> K = 9*c contraction,
    instead of 9 tiny K=c matmuls (much better MXU utilization at small channel counts).
    """
    cols = []
    for dy in range(3):
        for dx in range(3):
            cols.append(pad_ref[dy:dy + ho, dx:dx + wo, :])      # (ho, wo, c)
    patches = jnp.concatenate(cols, axis=-1).reshape(ho * wo, 9 * c)
    return jnp.dot(patches, w_ref[...], preferred_element_type=jnp.float32)  # (ho*wo, Cout)


def _partial_stats(y):
    """(rows, C) -> (1, 2, C) [sum, sum-of-squares] for the two-pass BatchNorm."""
    s = jnp.sum(y, axis=0, keepdims=True)
    ss = jnp.sum(y * y, axis=0, keepdims=True)
    return jnp.concatenate([s, ss], axis=0).reshape(1, 2, y.shape[1])


# ----------------------------- kernels ------------------------------------------------


def pool_conv1_kernel(x_ref, w_ref, y_ref, stats_ref, pad_ref):
    """Per image: MaxPool2d(2) + 3x3 conv (pre-BN). Emits y1 and per-image BN partial sums.

    x_ref is a (1, Ho, 2, Wo, 2*Cin) view of the NHWC input (free wrapper reshape), so the
    2x2 pooling window is a max over one leading pair-dim and two lane sub-slices.
    """
    _, ho, _, wo, _ = x_ref.shape
    cin = w_ref.shape[0] // 9
    cmid = w_ref.shape[1]

    xb = x_ref[0].astype(jnp.float32)                       # (Ho, 2, Wo, 2*Cin)
    m = jnp.maximum(xb[:, 0], xb[:, 1])                     # max over the H pair
    pooled = jnp.maximum(m[:, :, :cin], m[:, :, cin:])      # max over the W pair -> (Ho, Wo, Cin)

    _zero_halo(pad_ref, ho + 2, wo + 2, cin)                # halo-only zeroing
    pad_ref[1:ho + 1, 1:wo + 1, :] = pooled                 # interior write

    y = _conv3x3_im2col(pad_ref, w_ref, ho, wo, cin)        # (Ho*Wo, Cmid) f32
    stats_ref[...] = _partial_stats(y)
    y_ref[...] = y.reshape(1, ho, wo, cmid).astype(y_ref.dtype)


def bn_relu_conv2_kernel(y1_ref, w_ref, scale_ref, shift_ref, y_ref, stats_ref, pad_ref):
    """Per image: BN1 (folded scale/shift) + ReLU written straight into the padded scratch,
    then 3x3 conv (pre-BN2). Emits y2 and per-image BN partial sums."""
    _, ho, wo, cmid = y1_ref.shape
    cout = w_ref.shape[1]

    # (1, Cmid) scale/shift broadcast against (Ho, Wo, Cmid); FMA form for the VPU.
    h1 = jnp.maximum(
        y1_ref[0].astype(jnp.float32) * scale_ref[...] + shift_ref[...], 0.0)  # (Ho, Wo, Cmid)

    _zero_halo(pad_ref, ho + 2, wo + 2, cmid)
    pad_ref[1:ho + 1, 1:wo + 1, :] = h1                     # no separate h1 buffer

    y = _conv3x3_im2col(pad_ref, w_ref, ho, wo, cmid)       # (Ho*Wo, Cout) f32
    stats_ref[...] = _partial_stats(y)
    y_ref[...] = y.reshape(1, ho, wo, cout).astype(y_ref.dtype)


def bn_relu_kernel(y_ref, scale_ref, shift_ref, o_ref):
    """Final BN2 + ReLU on lane-dense (ipb, Ho, Wo*Cout) tiles (unmasked, wide stores)."""
    o_ref[...] = jnp.maximum(
        y_ref[...].astype(jnp.float32) * scale_ref[...] + shift_ref[...], 0.0
    ).astype(o_ref.dtype)


# ----------------------------- wrapper -------------------------------------------------


def _fold_bn(sum_nc, sumsq_nc, gamma, beta, count):
    """Fold biased batch stats (one-pass E[x^2]-E[x]^2) + affine into scale/shift."""
    mean = jnp.sum(sum_nc, axis=0) / count
    var = jnp.sum(sumsq_nc, axis=0) / count - mean * mean
    scale = gamma.reshape(-1) * jax.lax.rsqrt(var + BN_EPS)
    shift = beta.reshape(-1) - mean * scale
    return scale, shift


def _images_per_step(n, bytes_per_image, budget=4 << 20):
    """Largest divisor of n whose per-step block stays under ~budget bytes."""
    for cand in range(n, 0, -1):
        if n % cand == 0 and cand * bytes_per_image <= budget:
            return cand
    return 1


def down_forward(x_nchw, params):
    """_Down forward. x_nchw: (N, Cin, H, W) -> (N, Cout, H//2, W//2)."""
    w1, g1, b1, w2, g2, b2 = params
    x = jnp.transpose(x_nchw, (0, 2, 3, 1))                 # NCHW -> NHWC
    N, H, W, Cin = x.shape
    # PyTorch MaxPool2d(2) floors odd spatial dims; this kernel assumes even H/W.
    assert H % 2 == 0 and W % 2 == 0, "H and W must be even for MaxPool2d(2)"
    Ho, Wo = H // 2, W // 2
    Cmid, Cout = w1.shape[-1], w2.shape[-1]
    count = N * Ho * Wo

    # HWIO -> (9*Cin, Cout); row order (dy, dx, cin) matches the in-kernel im2col concat.
    w1m = w1.reshape(9 * Cin, Cmid)
    w2m = w2.reshape(9 * Cmid, Cout)

    cparams = pltpu.CompilerParams(dimension_semantics=("parallel",))

    # Free contiguous reshape: pooling pairs land in a leading dim (H) and the lane dim (W).
    xp = x.reshape(N, Ho, 2, Wo, 2 * Cin)

    # ---- call 1: maxpool + conv1 (pre-BN) + per-image BN1 partial stats ----------------
    y1, st1 = pl.pallas_call(
        pool_conv1_kernel,
        grid=(N,),
        in_specs=[
            pl.BlockSpec((1, Ho, 2, Wo, 2 * Cin), lambda n: (n, 0, 0, 0, 0)),
            pl.BlockSpec((9 * Cin, Cmid), lambda n: (0, 0)),    # resident across grid steps
        ],
        out_specs=[
            pl.BlockSpec((1, Ho, Wo, Cmid), lambda n: (n, 0, 0, 0)),
            pl.BlockSpec((1, 2, Cmid), lambda n: (n, 0, 0)),
        ],
        out_shape=[
            jax.ShapeDtypeStruct((N, Ho, Wo, Cmid), INTER_DTYPE),
            jax.ShapeDtypeStruct((N, 2, Cmid), jnp.float32),
        ],
        scratch_shapes=[pltpu.VMEM((Ho + 2, Wo + 2, Cin), jnp.float32)],
        compiler_params=cparams,
    )(xp, w1m)

    sc1, sh1 = _fold_bn(st1[:, 0, :], st1[:, 1, :], g1, b1, count)

    # ---- call 2: BN1 + ReLU (folded) + conv2 (pre-BN) + per-image BN2 partial stats ----
    y2, st2 = pl.pallas_call(
        bn_relu_conv2_kernel,
        grid=(N,),
        in_specs=[
            pl.BlockSpec((1, Ho, Wo, Cmid), lambda n: (n, 0, 0, 0)),
            pl.BlockSpec((9 * Cmid, Cout), lambda n: (0, 0)),
            pl.BlockSpec((1, Cmid), lambda n: (0, 0)),
            pl.BlockSpec((1, Cmid), lambda n: (0, 0)),
        ],
        out_specs=[
            pl.BlockSpec((1, Ho, Wo, Cout), lambda n: (n, 0, 0, 0)),
            pl.BlockSpec((1, 2, Cout), lambda n: (n, 0, 0)),
        ],
        out_shape=[
            jax.ShapeDtypeStruct((N, Ho, Wo, Cout), INTER_DTYPE),
            jax.ShapeDtypeStruct((N, 2, Cout), jnp.float32),
        ],
        scratch_shapes=[pltpu.VMEM((Ho + 2, Wo + 2, Cmid), jnp.float32)],
        compiler_params=cparams,
    )(y1, w2m, sc1.reshape(1, Cmid), sh1.reshape(1, Cmid))

    sc2, sh2 = _fold_bn(st2[:, 0, :], st2[:, 1, :], g2, b2, count)

    # ---- call 3: BN2 + ReLU on a lane-dense (N, Ho, Wo*Cout) layout --------------------
    # Purely elementwise + mem-bound: batch several images per grid step so each tile is
    # large and lane-dense (fewer grid steps, unmasked wide stores).
    y2f = y2.reshape(N, Ho, Wo * Cout)                       # free (contiguous minor merge)
    sc2f = jnp.tile(sc2, Wo).reshape(1, Wo * Cout)
    sh2f = jnp.tile(sh2, Wo).reshape(1, Wo * Cout)
    ipb = _images_per_step(N, Ho * Wo * Cout * 4)
    outf = pl.pallas_call(
        bn_relu_kernel,
        grid=(N // ipb,),
        in_specs=[
            pl.BlockSpec((ipb, Ho, Wo * Cout), lambda i: (i, 0, 0)),
            pl.BlockSpec((1, Wo * Cout), lambda i: (0, 0)),
            pl.BlockSpec((1, Wo * Cout), lambda i: (0, 0)),
        ],
        out_specs=pl.BlockSpec((ipb, Ho, Wo * Cout), lambda i: (i, 0, 0)),
        out_shape=jax.ShapeDtypeStruct((N, Ho, Wo * Cout), x.dtype),
        compiler_params=cparams,
    )(y2f, sc2f, sh2f)

    out = outf.reshape(N, Ho, Wo, Cout)
    return jnp.transpose(out, (0, 3, 1, 2))                  # NHWC -> NCHW


# ----------------------------- pure-JAX reference --------------------------------------


def ref_forward(x_nchw, params):
    w1, g1, b1, w2, g2, b2 = params
    x = jnp.transpose(x_nchw, (0, 2, 3, 1))
    N, H, W, C = x.shape
    p = jnp.max(x.reshape(N, H // 2, 2, W // 2, 2, C), axis=(2, 4))

    def conv_bn_relu(h, w, g, b):
        y = jax.lax.conv_general_dilated(
            h, w, (1, 1), ((1, 1), (1, 1)),
            dimension_numbers=("NHWC", "HWIO", "NHWC"))
        m = jnp.mean(y, axis=(0, 1, 2), keepdims=True)
        v = jnp.mean((y - m) ** 2, axis=(0, 1, 2), keepdims=True)
        return jnp.maximum(
            (y - m) / jnp.sqrt(v + BN_EPS) * g.reshape(1, 1, 1, -1) + b.reshape(1, 1, 1, -1),
            0.0)

    h1 = conv_bn_relu(p, w1, g1, b1)
    h2 = conv_bn_relu(h1, w2, g2, b2)
    return jnp.transpose(h2, (0, 3, 1, 2))


if __name__ == "__main__":
    key = jax.random.PRNGKey(0)
    N, Cin, H, W = 2, 4, 16, 16
    Cout = 8                                  # mid_channels defaults to out_channels

    kx, k1, k2 = jax.random.split(key, 3)
    x = jax.random.normal(kx, (N, Cin, H, W), jnp.float32)

    # Conv weights in HWIO layout (= PyTorch OIHW transposed (2,3,1,0)), kaiming-uniform-ish.
    fan1 = Cin * 9
    w1 = jax.random.uniform(k1, (3, 3, Cin, Cout), jnp.float32, -1.0, 1.0) / jnp.sqrt(fan1)
    fan2 = Cout * 9
    w2 = jax.random.uniform(k2, (3, 3, Cout, Cout), jnp.float32, -1.0, 1.0) / jnp.sqrt(fan2)
    # BatchNorm2d default init: gamma=1, beta=0.
    g1 = jnp.ones((1, Cout), jnp.float32)
    b1 = jnp.zeros((1, Cout), jnp.float32)
    g2 = jnp.ones((1, Cout), jnp.float32)
    b2 = jnp.zeros((1, Cout), jnp.float32)
    params = (w1, g1, b1, w2, g2, b2)

    out = jax.block_until_ready(down_forward(x, params))
    ref = jax.block_until_ready(ref_forward(x, params))

    assert out.shape == (N, Cout, H // 2, W // 2), out.shape
    assert jnp.allclose(out, ref, atol=1e-4, rtol=1e-4), float(jnp.max(jnp.abs(out - ref)))
    print("KERNEL_OK")
</pallas_src>

<mosaic_0001>
module attributes {stable_mosaic.version = 11 : i64} {
  func.func @pool_conv1_kernel(%arg0: i32, %arg1: memref<1x8x2x8x8xf32, #tpu.memory_space<vmem>>, %arg2: memref<36x8xf32, #tpu.memory_space<vmem>>, %arg3: memref<1x8x8x8xf32, #tpu.memory_space<vmem>>, %arg4: memref<1x2x8xf32, #tpu.memory_space<vmem>>, %arg5: memref<10x10x4xf32, #tpu.memory_space<vmem>>) attributes {dimension_semantics = [#tpu.dimension_semantics<parallel>], iteration_bounds = array<i64: 2>, scalar_prefetch = 0 : i64, scratch_operands = 1 : i64, tpu.core_type = #tpu.core_type<tc>, window_params = [{transform_indices = @transform_0, window_bounds = array<i64: 1, 8, 2, 8, 8>}, {pipeline_mode = #tpu.pipeline_mode<synchronous>, transform_indices = @transform_1, window_bounds = array<i64: 36, 8>}, {transform_indices = @transform_2, window_bounds = array<i64: 1, 8, 8, 8>}, {transform_indices = @transform_3, window_bounds = array<i64: 1, 2, 8>}]} {
    %c0 = arith.constant 0 : index
    %c0_0 = arith.constant 0 : index
    %c0_1 = arith.constant 0 : index
    %c0_2 = arith.constant 0 : index
    %c0_3 = arith.constant 0 : index
    %0 = vector.load %arg1[%c0, %c0_0, %c0_1, %c0_2, %c0_3] : memref<1x8x2x8x8xf32, #tpu.memory_space<vmem>>, vector<1x8x2x8x8xf32>
    %1 = vector.shape_cast %0 : vector<1x8x2x8x8xf32> to vector<8x2x8x8xf32>
    %2 = vector.extract_strided_slice %1 {offsets = [0, 0, 0, 0], sizes = [8, 1, 8, 8], strides = [1, 1, 1, 1]} : vector<8x2x8x8xf32> to vector<8x1x8x8xf32>
    %3 = vector.shape_cast %2 : vector<8x1x8x8xf32> to vector<8x8x8xf32>
    %4 = vector.extract_strided_slice %1 {offsets = [0, 1, 0, 0], sizes = [8, 1, 8, 8], strides = [1, 1, 1, 1]} : vector<8x2x8x8xf32> to vector<8x1x8x8xf32>
    %5 = vector.shape_cast %4 : vector<8x1x8x8xf32> to vector<8x8x8xf32>
    %6 = arith.maximumf %3, %5 : vector<8x8x8xf32>
    %7 = vector.extract_strided_slice %6 {offsets = [0, 0, 0], sizes = [8, 8, 4], strides = [1, 1, 1]} : vector<8x8x8xf32> to vector<8x8x4xf32>
    %8 = vector.extract_strided_slice %6 {offsets = [0, 0, 4], sizes = [8, 8, 4], strides = [1, 1, 1]} : vector<8x8x8xf32> to vector<8x8x4xf32>
    %9 = arith.maximumf %7, %8 : vector<8x8x4xf32>
    %cst = arith.constant 0.000000e+00 : f32
    %10 = vector.broadcast %cst : f32 to vector<1x10x4xf32>
    %cst_4 = arith.constant 0.000000e+00 : f32
    %11 = vector.broadcast %cst_4 : f32 to vector<10x1x4xf32>
    %c0_5 = arith.constant 0 : index
    %c0_6 = arith.constant 0 : index
    %c0_7 = arith.constant 0 : index
    %12 = vector.load %arg5[%c0_5, %c0_6, %c0_7] : memref<10x10x4xf32, #tpu.memory_space<vmem>>, vector<1x10x4xf32>
    tpu.vector_store %arg5[%c0_5, %c0_6, %c0_7], %10 {strides = array<i32>} : memref<10x10x4xf32, #tpu.memory_space<vmem>>, vector<1x10x4xf32>,
    %c9 = arith.constant 9 : index
    %c0_8 = arith.constant 0 : index
    %c0_9 = arith.constant 0 : index
    %13 = vector.load %arg5[%c9, %c0_8, %c0_9] : memref<10x10x4xf32, #tpu.memory_space<vmem>>, vector<1x10x4xf32>
    tpu.vector_store %arg5[%c9, %c0_8, %c0_9], %10 {strides = array<i32>} : memref<10x10x4xf32, #tpu.memory_space<vmem>>, vector<1x10x4xf32>,
    %c0_10 = arith.constant 0 : index
    %c0_11 = arith.constant 0 : index
    %c0_12 = arith.constant 0 : index
    %14 = vector.load %arg5[%c0_10, %c0_11, %c0_12] : memref<10x10x4xf32, #tpu.memory_space<vmem>>, vector<10x1x4xf32>
    tpu.vector_store %arg5[%c0_10, %c0_11, %c0_12], %11 {strides = array<i32>} : memref<10x10x4xf32, #tpu.memory_space<vmem>>, vector<10x1x4xf32>,
    %c0_13 = arith.constant 0 : index
    %c9_14 = arith.constant 9 : index
    %c0_15 = arith.constant 0 : index
    %15 = vector.load %arg5[%c0_13, %c9_14, %c0_15] : memref<10x10x4xf32, #tpu.memory_space<vmem>>, vector<10x1x4xf32>
    tpu.vector_store %arg5[%c0_13, %c9_14, %c0_15], %11 {strides = array<i32>} : memref<10x10x4xf32, #tpu.memory_space<vmem>>, vector<10x1x4xf32>,
    %c1 = arith.constant 1 : index
    %c1_16 = arith.constant 1 : index
    %c0_17 = arith.constant 0 : index
    %16 = vector.load %arg5[%c1, %c1_16, %c0_17] : memref<10x10x4xf32, #tpu.memory_space<vmem>>, vector<8x8x4xf32>
    tpu.vector_store %arg5[%c1, %c1_16, %c0_17], %9 {strides = array<i32>} : memref<10x10x4xf32, #tpu.memory_space<vmem>>, vector<8x8x4xf32>,
    %c0_18 = arith.constant 0 : index
    %c0_19 = arith.constant 0 : index
    %c0_20 = arith.constant 0 : index
    %17 = vector.load %arg5[%c0_18, %c0_19, %c0_20] : memref<10x10x4xf32, #tpu.memory_space<vmem>>, vector<8x8x4xf32>
    %c0_21 = arith.constant 0 : index
    %c1_22 = arith.constant 1 : index
    %c0_23 = arith.constant 0 : index
    %18 = vector.load %arg5[%c0_21, %c1_22, %c0_23] : memref<10x10x4xf32, #tpu.memory_space<vmem>>, vector<8x8x4xf32>
    %c0_24 = arith.constant 0 : index
    %c2 = arith.constant 2 : index
    %c0_25 = arith.constant 0 : index
    %19 = vector.load %arg5[%c0_24, %c2, %c0_25] : memref<10x10x4xf32, #tpu.memory_space<vmem>>, vector<8x8x4xf32>
    %c1_26 = arith.constant 1 : index
    %c0_27 = arith.constant 0 : index
    %c0_28 = arith.constant 0 : index
    %20 = vector.load %arg5[%c1_26, %c0_27, %c0_28] : memref<10x10x4xf32, #tpu.memory_space<vmem>>, vector<8x8x4xf32>
    %c1_29 = arith.constant 1 : index
    %c1_30 = arith.constant 1 : index
    %c0_31 = arith.constant 0 : index
    %21 = vector.load %arg5[%c1_29, %c1_30, %c0_31] : memref<10x10x4xf32, #tpu.memory_space<vmem>>, vector<8x8x4xf32>
    %c1_32 = arith.constant 1 : index
    %c2_33 = arith.constant 2 : index
    %c0_34 = arith.constant 0 : index
    %22 = vector.load %arg5[%c1_32, %c2_33, %c0_34] : memref<10x10x4xf32, #tpu.memory_space<vmem>>, vector<8x8x4xf32>
    %c2_35 = arith.constant 2 : index
    %c0_36 = arith.constant 0 : index
    %c0_37 = arith.constant 0 : index
    %23 = vector.load %arg5[%c2_35, %c0_36, %c0_37] : memref<10x10x4xf32, #tpu.memory_space<vmem>>, vector<8x8x4xf32>
    %c2_38 = arith.constant 2 : index
    %c1_39 = arith.constant 1 : index
    %c0_40 = arith.constant 0 : index
    %24 = vector.load %arg5[%c2_38, %c1_39, %c0_40] : memref<10x10x4xf32, #tpu.memory_space<vmem>>, vector<8x8x4xf32>
    %c2_41 = arith.constant 2 : index
    %c2_42 = arith.constant 2 : index
    %c0_43 = arith.constant 0 : index
    %25 = vector.load %arg5[%c2_41, %c2_42, %c0_43] : memref<10x10x4xf32, #tpu.memory_space<vmem>>, vector<8x8x4xf32>
    %26 = tpu.concatenate %17, %18, %19, %20, %21, %22, %23, %24, %25 in 2 : vector<8x8x4xf32>, vector<8x8x4xf32>, vector<8x8x4xf32>, vector<8x8x4xf32>, vector<8x8x4xf32>, vector<8x8x4xf32>, vector<8x8x4xf32>, vector<8x8x4xf32>, vector<8x8x4xf32> -> vector<8x8x36xf32>
    %27 = vector.shape_cast %26 : vector<8x8x36xf32> to vector<64x36xf32>
    %c0_44 = arith.constant 0 : index
    %c0_45 = arith.constant 0 : index
    %28 = vector.load %arg2[%c0_44, %c0_45] : memref<36x8xf32, #tpu.memory_space<vmem>>, vector<36x8xf32>
    %cst_46 = arith.constant dense<0.000000e+00> : vector<64x8xf32>
    %29 = tpu.matmul %27, %28, %cst_46 {dimension_numbers = #tpu.dot_dimension_numbers<[1], [0], [0], [1], [0, 0, 1, 1], [], []>} : vector<64x36xf32>, vector<36x8xf32>, vector<64x8xf32> -> vector<64x8xf32>
    %cst_47 = arith.constant dense<0.000000e+00> : vector<8xf32>
    %30 = vector.multi_reduction <add>, %29, %cst_47 [0] : vector<64x8xf32> to vector<8xf32>
    %31 = vector.shape_cast %30 : vector<8xf32> to vector<1x8xf32>
    %32 = arith.mulf %29, %29 : vector<64x8xf32>
    %cst_48 = arith.constant dense<0.000000e+00> : vector<8xf32>
    %33 = vector.multi_reduction <add>, %32, %cst_48 [0] : vector<64x8xf32> to vector<8xf32>
    %34 = vector.shape_cast %33 : vector<8xf32> to vector<1x8xf32>
    %35 = tpu.concatenate %31, %34 in 0 : vector<1x8xf32>, vector<1x8xf32> -> vector<2x8xf32>
    %36 = vector.shape_cast %35 : vector<2x8xf32> to vector<1x2x8xf32>
    %c0_49 = arith.constant 0 : index
    %c0_50 = arith.constant 0 : index
    %c0_51 = arith.constant 0 : index
    %37 = vector.load %arg4[%c0_49, %c0_50, %c0_51] : memref<1x2x8xf32, #tpu.memory_space<vmem>>, vector<1x2x8xf32>
    tpu.vector_store %arg4[%c0_49, %c0_50, %c0_51], %36 {strides = array<i32>} : memref<1x2x8xf32, #tpu.memory_space<vmem>>, vector<1x2x8xf32>,
    %38 = vector.shape_cast %29 : vector<64x8xf32> to vector<1x8x8x8xf32>
    %c0_52 = arith.constant 0 : index
    %c0_53 = arith.constant 0 : index
    %c0_54 = arith.constant 0 : index
    %c0_55 = arith.constant 0 : index
    %39 = vector.load %arg3[%c0_52, %c0_53, %c0_54, %c0_55] : memref<1x8x8x8xf32, #tpu.memory_space<vmem>>, vector<1x8x8x8xf32>
    tpu.vector_store %arg3[%c0_52, %c0_53, %c0_54, %c0_55], %38 {strides = array<i32>} : memref<1x8x8x8xf32, #tpu.memory_space<vmem>>, vector<1x8x8x8xf32>,
    return
  }
  func.func @transform_0(%arg0: i32) -> (i32, i32, i32, i32, i32) {
    %c0_i32 = arith.constant 0 : i32
    %c0_i32_0 = arith.constant 0 : i32
    %c0_i32_1 = arith.constant 0 : i32
    %c0_i32_2 = arith.constant 0 : i32
    %c0_i32_3 = arith.constant 0 : i32
    return %arg0, %c0_i32, %c0_i32_0, %c0_i32_1, %c0_i32_2 : i32, i32, i32, i32, i32
  }
  func.func @transform_1(%arg0: i32) -> (i32, i32) {
    %c0_i32 = arith.constant 0 : i32
    %c0_i32_0 = arith.constant 0 : i32
    %c0_i32_1 = arith.constant 0 : i32
    return %c0_i32, %c0_i32_0 : i32, i32
  }
  func.func @transform_2(%arg0: i32) -> (i32, i32, i32, i32) {
    %c0_i32 = arith.constant 0 : i32
    %c0_i32_0 = arith.constant 0 : i32
    %c0_i32_1 = arith.constant 0 : i32
    %c0_i32_2 = arith.constant 0 : i32
    return %arg0, %c0_i32, %c0_i32_0, %c0_i32_1 : i32, i32, i32, i32
  }
  func.func @transform_3(%arg0: i32) -> (i32, i32, i32) {
    %c0_i32 = arith.constant 0 : i32
    %c0_i32_0 = arith.constant 0 : i32
    %c0_i32_1 = arith.constant 0 : i32
    return %arg0, %c0_i32, %c0_i32_0 : i32, i32, i32
  }
}

</mosaic_0001>

<bundles_post_ra>
// kernel: tpu_custom_call.1
= control target key start
LH: loop header
LB: loop body
LE: loop exit
PB: predicated region body
PF: predicated region fallthrough
CT: control target
= control target key end

     0   :  { %9 = vsyncpa [#allocation4], 0  ;;  %s1821_s0 = inlined_call_operand.hbm [shape: f32[2,8,2,8,8], index: 0, kind: input, shape index: {}]   ;;  %s1822_s1 = inlined_call_operand.vmem [shape: f32[36,8], index: 1, kind: input, shape index: {}]   ;;  %s1823_s2 = inlined_call_operand.hbm [shape: f32[2,8,8,8], index: 2, kind: output, shape index: {0}]   ;;  %s1824_s3 = inlined_call_operand.hbm [shape: f32[2,2,8], index: 3, kind: output, shape index: {1}]  }
   0x1   :  { %11 = vsyncpa [#allocation4 + $0x1], 0 }
   0x2   :  { %12 = vsyncpa [#allocation5], 0 }
   0x3   :  { %14 = vsyncpa [#allocation5 + $0x1], 0 }
   0x4   :  { %15 = vsyncpa [#allocation8], 0 }
   0x5   :  { %17 = vsyncpa [#allocation8 + $0x1], 0  ;;  %s1346_s12 = smov 0   ;;  %s1348_s13 = smov 0  }
   0x6   :  { %s1350_s14 = smov 0   ;;  %s1352_s15 = smov 0  }
   0x7 LB: > { %s1367_s16 = sadd.s32 4294967295, %s1308_s15   ;;  %s1039_s17 = sadd.s32 4294967294, %s1308_s15   ;;  %s1308_s15 = sphi %s1352_s15, %s1837_s15   ;;  %s1304_s14 = sphi %s1350_s14, %s1836_s14   ;;  %s1300_s13 = sphi %s1348_s13, %s1835_s13   ;;  %s1296_s12 = sphi %s1346_s12, %s1834_s12  }
   0x8   : > { %s1371_s18 = sadd.s32 1, %s1308_s15   ;;  %s30_s19 = sadd.s32 1, %s1304_s14 }
   0x9   : > { %s27_s20 = ssub.s32 %s1308_s15, %s1371_s18  ;;  %p37_p0 = scmp.ne.s32.totalorder %s1304_s14, %s1300_s13 }
   0xa   : > { %p28_p1 = scmp.eq.s32.totalorder %s27_s20, 0  ;;  %p38_p2 = scmp.eq.s32.totalorder %s1308_s15, 0 }
   0xb   : > { %p43_p3 = scmp.ne.s32.totalorder %s1300_s13, %s1296_s12  ;;  %p44_p4 = scmp.eq.s32.totalorder %s1367_s16, 0 }
   0xc   : > { %s1383_s21 = scalar_select %p28_p1, %s1304_s14, %s30_s19  }
   0xd   : > { %p1385_p5 = por %p38_p2, %p37_p0  ;;  %p1389_p6 = por %p44_p4, %p43_p3 }
   0xe   : > { %p88_p7 = scmp.eq.s32.totalorder %s1367_s16, 1  ;;  %p94_p8 = scmp.eq.s32.totalorder %s1039_s17, 1 }
   0xf   : > { %p1133_p10 = scmp.lt.s32.totalorder %s1308_s15, 2  ;;  %s143_s26 = sand.u32 1, %s1304_s14  }
  0x10   : > { %p1396_p11 = por %p88_p7, %p37_p0  ;;  %p1400_p12 = por %p94_p8, %p43_p3 }
  0x11   : > { %s1065_s27 = sshll.u32 %s1308_s15, 11  ;;  %s1042_s28 = sshll.u32 %s143_s26, 7 }
  0x12   : > { %s1828_s24 = scalar_select %p1396_p11, 1, 0 }
  0x13   : > { %s1829_s25 = scalar_select %p1400_p12, 1, 0 }
  0x14   : > { %s1409_s4 = scalar_lea.hbm %s1821_s0, %s1065_s27  ;;  %s147_s5 = scalar_lea.vmem [#allocation3], %s1042_s28 }
  0x15   : > { %s154_s6 = sshll.u32 %s147_s5, 4  ;;  %p1413_p13 = pnand %p1133_p10, %p1385_p5  ;;  %s1417_s6 = int_to_ptr.vmem [resolvable:$true] %s154_s6 }
  0x16   : > { %s1419_s8 = scalar_lea.sflag [#allocation4], %s143_s26  ;;  %s1180_s9 = scalar_lea.hbm %s1409_s4, 2048 }
  0x17   : > { %p1181_p0 = scmp.ne.s32.totalorder %s1409_s4, %s1180_s9  ;;  %p1182_p1 = pneg %p1413_p13 }
  0x18   : > { %s1185_s17 = scalar_lea.hbm %s1821_s0, 4096  ;;  %p1186_p4 = scmp.lt.u32.totalorder %s1409_s4, %s1821_s0 }
  0x19   : > { %p1183_p2 = pnand %p1182_p1, %p1181_p0  ;;  %p1187_p5 = scmp.lt.u32.totalorder %s1185_s17, %s1180_s9 }
  0x1a   : > { %p1189_p8 = scmp.lt.u32.totalorder %s1180_s9, %s1409_s4 }
  0x1b   : > { %p1184_p3 = pneg %p1183_p2  ;;  %p1188_p7 = por %p1187_p5, %p1186_p4 }
  0x1d   : > { %p1190_p10 = por %p1189_p8, %p1188_p7 }
  0x1f   : > { %p1191_p9 = pnand %p1190_p10, %p1184_p3 }
  0x21   : > { %1194 = shalt.err (!%p1191_p9)
}
  0x22   : > { %s1195_s22 = scalar_lea.vmem %s1417_s6, 2048  ;;  %s1310_s26 = smov [#allocation3]  }
  0x23   : > { %p1196_p0 = scmp.ne.s32.totalorder %s1417_s6, %s1195_s22  ;;  %s1200_s27 = sshll.u32 %s1310_s26, 4  ;;  %s1201_s27 = int_to_ptr.vmem [resolvable:$false] %s1200_s27 }
  0x24   : > { %s1202_s28 = scalar_lea.vmem %s1201_s27, 4096  ;;  %p1203_p11 = scmp.lt.s32.totalorder %s1417_s6, %s1201_s27 }
  0x25   : > { %p1198_p2 = pnand %p1196_p0, %p1182_p1  ;;  %p1204_p4 = scmp.lt.s32.totalorder %s1202_s28, %s1195_s22 }
  0x27   : > { %p1199_p12 = pneg %p1198_p2  ;;  %p1205_p5 = por %p1204_p4, %p1203_p11 }
  0x29   : > { %p1206_p7 = pnand %p1205_p5, %p1199_p12 }
  0x2b   : > { %1209 = shalt.err (!%p1206_p7)
}
  0x2c   : > { %s1311_s29 = smov 128   ;;  %s1312_s30 = smov 8  }
  0x2d   : > { %1125 = dma.hbm_to_vmem [thread:$0]  (!%p1413_p13), %s1409_s4, 2048, %s1417_s6, %s1419_s8, %s1311_s29, %s1311_s29, %s1312_s30  }
  0x2e   : > { %p1045_p9 = scmp.ge.s32.totalorder %s1308_s15, 1  ;;  %p162_p1 = scmp.lt.s32.totalorder %s1308_s15, 3 }
  0x30   : > { %p163_p3 = pnand %p1045_p9, %p162_p1 }
  0x31   : > { %s1450_s5 = sand.u32 (!%p163_p3), 1, %s1300_s13  }
  0x32   : > { %166 = sbr.rel (%p163_p3) target bundleno = 683 (0x2ab), region = 28  ;;  %s1046_s9 = sshll.u32 (!%p163_p3), %s1450_s5, 7 }
  0x33   : > { %s169_s10 = scalar_lea.sflag (!%p163_p3), [#allocation4], %s1450_s5  ;;  %s1454_s11 = scalar_lea.vmem (!%p163_p3), [#allocation3], %s1046_s9 }
  0x39   : > { %1283 = dma.done.wait (%p1389_p6), %s169_s10, 2048  }
  0x3a   : > { %1285 = vsyncadd (%p1389_p6), %s169_s10, 4294965248  ;;  %vm264_vm0 = vcmask 31744   ;;  %vm266_vm1 = vcmask 25600   ;;  %v1313_v0 = vmov 0.0   ;;  %vm271_vm2 = vcmask 24576   ;;  %v200_v1 = vld [vmem:[%s1454_s11] sm:$0xff] }
  0x3b   : > { %265 = vst.msk [vmem:[#allocation2] sm:$0xff] %vm264_vm0, %v1313_v0  ;;  %269 = vst.msk [vmem:[#allocation2 + $0x90] sm:$0xff] %vm264_vm0, %v1313_v0  ;;  %v201_v2 = vld [vmem:[%s1454_s11 + $0x8] sm:$0xff]  ;;  %v202_v3 = vld [vmem:[%s1454_s11 + $0x10] sm:$0xff]  ;;  %s1314_s23 = smov 124   ;;  %s1315_s4 = smov 4  }
  0x3c   : > { %267 = vst.msk [vmem:[#allocation2 + $0x8] sm:$0x3] %vm266_vm1, %v1313_v0  ;;  %270 = vst.msk [vmem:[#allocation2 + $0x98] sm:$0x3] %vm266_vm1, %v1313_v0  ;;  %v216_v4 = vmax.f32 %v200_v1, %v201_v2  ;;  %v203_v5 = vld [vmem:[%s1454_s11 + $0x18] sm:$0xff]  ;;  %v204_v6 = vld [vmem:[%s1454_s11 + $0x20] sm:$0xff] }
  0x3d   : > { %281 = vst.msk [vmem:[#allocation2 + $0x90] sm:$0x1] %vm271_vm2, %v1313_v0  ;;  %272 = vst.msk [vmem:[#allocation2] sm:$0x1] %vm271_vm2, %v1313_v0  ;;  %v205_v7 = vld [vmem:[%s1454_s11 + $0x28] sm:$0xff]  ;;  %v206_v9 = vld [vmem:[%s1454_s11 + $0x30] sm:$0xff]  ;;  %v217_v11 = vmax.f32 %v202_v3, %v203_v5 }
  0x3e   : > { %273 = vst.msk [vmem:[#allocation2 + $0x10] sm:$0x1] %vm271_vm2, %v1313_v0  ;;  %274 = vst.msk [vmem:[#allocation2 + $0x20] sm:$0x1] %vm271_vm2, %v1313_v0  ;;  %v218_v8 = vmax.f32 %v204_v6, %v205_v7  ;;  %v207_v10 = vld [vmem:[%s1454_s11 + $0x38] sm:$0xff]  ;;  %232 = vrot.lane.b32.xlu0 %v216_v4, %s1314_s23  ;;  %v208_v13 = vld [vmem:[%s1454_s11 + $0x40] sm:$0xff] }
  0x3f   : > { %275 = vst.msk [vmem:[#allocation2 + $0x30] sm:$0x1] %vm271_vm2, %v1313_v0  ;;  %276 = vst.msk [vmem:[#allocation2 + $0x40] sm:$0x1] %vm271_vm2, %v1313_v0  ;;  %v219_v12 = vmax.f32 %v206_v9, %v207_v10  ;;  %v209_v14 = vld [vmem:[%s1454_s11 + $0x48] sm:$0xff]  ;;  %v210_v15 = vld [vmem:[%s1454_s11 + $0x50] sm:$0xff] }
  0x40   : > { %277 = vst.msk [vmem:[#allocation2 + $0x50] sm:$0x1] %vm271_vm2, %v1313_v0  ;;  %278 = vst.msk [vmem:[#allocation2 + $0x60] sm:$0x1] %vm271_vm2, %v1313_v0  ;;  %236 = vrot.lane.b32.xlu1 %v218_v8, %s1314_s23  ;;  %v211_v16 = vld [vmem:[%s1454_s11 + $0x58] sm:$0xff]  ;;  %v220_v17 = vmax.f32 %v208_v13, %v209_v14  ;;  %v212_v19 = vld [vmem:[%s1454_s11 + $0x60] sm:$0xff] }
  0x41   : > { %279 = vst.msk [vmem:[#allocation2 + $0x70] sm:$0x1] %vm271_vm2, %v1313_v0  ;;  %280 = vst.msk [vmem:[#allocation2 + $0x80] sm:$0x1] %vm271_vm2, %v1313_v0  ;;  %v221_v18 = vmax.f32 %v210_v15, %v211_v16  ;;  %v213_v20 = vld [vmem:[%s1454_s11 + $0x68] sm:$0xff]  ;;  %v214_v21 = vld [vmem:[%s1454_s11 + $0x70] sm:$0xff] }
  0x42   : > { %282 = vst.msk [vmem:[#allocation2 + $0x9] sm:$0x1] %vm271_vm2, %v1313_v0  ;;  %283 = vst.msk [vmem:[#allocation2 + $0x19] sm:$0x1] %vm271_vm2, %v1313_v0  ;;  %234 = vrot.lane.b32.xlu0 %v217_v11, %s1314_s23  ;;  %v215_v22 = vld [vmem:[%s1454_s11 + $0x78] sm:$0xff]  ;;  %v222_v23 = vmax.f32 %v212_v19, %v213_v20  ;;  %s1316_s6 = smov 24  }
  0x43   : > { %284 = vst.msk [vmem:[#allocation2 + $0x29] sm:$0x1] %vm271_vm2, %v1313_v0  ;;  %285 = vst.msk [vmem:[#allocation2 + $0x39] sm:$0x1] %vm271_vm2, %v1313_v0  ;;  %v223_v24 = vmax.f32 %v214_v21, %v215_v22  ;;  %v309_v25 = vld [vmem:[#allocation2 + $0x1] sm:$0xff]  ;;  %s1317_s7 = smov 8  }
  0x44   : > { %286 = vst.msk [vmem:[#allocation2 + $0x49] sm:$0x1] %vm271_vm2, %v1313_v0  ;;  %287 = vst.msk [vmem:[#allocation2 + $0x59] sm:$0x1] %vm271_vm2, %v1313_v0  ;;  %238 = vrot.lane.b32.xlu1 %v219_v12, %s1314_s23  ;;  %v357_v26 = vld [vmem:[#allocation2 + $0x90] sm:$0xff]  ;;  %s1318_s8 = smov 12  }
  0x45   : > { %288 = vst.msk [vmem:[#allocation2 + $0x69] sm:$0x1] %vm271_vm2, %v1313_v0  ;;  %289 = vst.msk [vmem:[#allocation2 + $0x79] sm:$0x1] %vm271_vm2, %v1313_v0  ;;  %s1319_s17 = smov 16   ;;  %s1320_s19 = smov 20  }
  0x46   : > { %290 = vst.msk [vmem:[#allocation2 + $0x89] sm:$0x1] %vm271_vm2, %v1313_v0  ;;  %291 = vst.msk [vmem:[#allocation2 + $0x99] sm:$0x1] %vm271_vm2, %v1313_v0  ;;  %240 = vrot.lane.b32.xlu0 %v220_v17, %s1314_s23  ;;  %v701_v53 = vld [vmem:[%s1822_s1] sm:$0xff]  ;;  %v702_v54 = vld [vmem:[%s1822_s1 + $0x8] sm:$0xff] }
  0x47   : > { %v1102_v55 = vpack.c.bf16 %v702_v54, %v701_v53  ;;  %v703_v57 = vld [vmem:[%s1822_s1 + $0x10] sm:$0xff]  ;;  %v704_v58 = vld [vmem:[%s1822_s1 + $0x18] sm:$0xff]  ;;  %v705_v60 = vld [vmem:[%s1822_s1 + $0x20] sm:$0xf]  ;;  %vm731_vm3 = vcmask 1043456   ;;  %s1322_s20 = smov 32  }
  0x48   : > { %242 = vrot.lane.b32.xlu1 %v221_v18, %s1314_s23  ;;  %v1106_v59 = vpack.c.bf16 %v704_v58, %v703_v57  ;;  %v365_v14 = vld [vmem:[#allocation2 + $0x91] sm:$0xff]  ;;  %vm638_vm4 = vcmask 64512   ;;  %vm647_vm5 = vcmask 97280   ;;  %vm656_vm6 = vcmask 130048   ;;  %s903_s27 = scalar_lea.sflag [#allocation5], %s1450_s5  ;;  %p1831_p11 = scmp.ne.s32.totalorder %s1828_s24, 0 }
  0x49   : > { %v317_v27 = vld [vmem:[#allocation2 + $0x2] sm:$0xff]  ;;  %1103 = vmatprep.subr.bf16.mxu0 %v1102_v55  ;;  %1110 = vmatprep.subr.bf16.mxu1 %v1102_v55  ;;  %vm665_vm7 = vcmask 162816   ;;  %vm674_vm8 = vcmask 195584   ;;  %vm683_vm9 = vcmask 228352   ;;  %vm692_vm10 = vcmask 261120   ;;  %s1323_s29 = smov [#allocation6]  }
  0x4a   : > { %244 = vrot.lane.b32.xlu0 %v222_v23, %s1314_s23  ;;  %1105 = vmatpush3.bf16.msra.mxu0 %v1102_v55  ;;  %vm706_vm11 = vcmask 293888   ;;  %s1214_s30 = sshll.u32 %s1323_s29, 4  ;;  %s1215_s30 = int_to_ptr.vmem [resolvable:$false] %s1214_s30 }
  0x4b   : > { %1113 = vmatpush3.bf16.msra.mxu1 %v1102_v55  ;;  %1107 = vmatprep.subr.bf16.mxu0 %v1106_v59  ;;  %s1216_s9 = scalar_lea.vmem %s1215_s30, 2048 }
  0x4c   : > { %246 = vrot.lane.b32.xlu1 %v223_v24, %s1314_s23  ;;  %1111 = vmatprep.subr.bf16.mxu1 %v1106_v59  ;;  %s1321_s23 = smov 28  }
  0x4e   : > { %382 = vrot.lane.b32.xlu0 %v309_v25, %s1315_s4  ;;  %1109 = vmatpush3.bf16.msra.mxu0 %v1106_v59 }
  0x4f   : > { %1114 = vmatpush3.bf16.msra.mxu1 %v1106_v59  ;;  %1088 = vmatprep.subr.msk.mxu0 %vm731_vm3, %v705_v60 }
  0x50   : > { %556 = vrot.lane.b32.xlu1 %v357_v26, %s1316_s6  ;;  %1112 = vmatprep.subr.msk.mxu1 %vm731_vm3, %v705_v60 }
  0x52   : > { %414 = vrot.lane.b32.xlu0 %v317_v27, %s1317_s7  ;;  %1089 = vmatpush3.msk.msra.mxu0 %vm731_vm3, %v705_v60 }
  0x53   : > { %1115 = vmatpush3.msk.msra.mxu1 %vm731_vm3, %v705_v60 }
  0xb0   : > { %v233_v28 = vpop.permute.xlu0 %232 }
  0xb1   : > { %v256_v29 = vmax.f32 %v216_v4, %v233_v28 }
  0xb2   : > { %v237_v30 = vpop.permute.xlu1 %236 }
  0xb3   : > { %v258_v31 = vmax.f32 %v218_v8, %v237_v30  ;;  %293 = vst.msk [vmem:[#allocation2 + $0x11] sm:$0xff] %vm264_vm0, %v256_v29 }
  0xb4   : > { %v235_v32 = vpop.permute.xlu0 %234 }
  0xb5   : > { %295 = vst.msk [vmem:[#allocation2 + $0x31] sm:$0xff] %vm264_vm0, %v258_v31  ;;  %v257_v33 = vmax.f32 %v217_v11, %v235_v32  ;;  %v301_v32 = vld [vmem:[#allocation2] sm:$0xff] }
  0xb6   : > { %v239_v34 = vpop.permute.xlu1 %238 }
  0xb7   : > { %v259_v35 = vmax.f32 %v219_v12, %v239_v34  ;;  %294 = vst.msk [vmem:[#allocation2 + $0x21] sm:$0xff] %vm264_vm0, %v257_v33 }
  0xb8   : > { %v241_v36 = vpop.permute.xlu0 %240 }
  0xb9   : > { %296 = vst.msk [vmem:[#allocation2 + $0x41] sm:$0xff] %vm264_vm0, %v259_v35  ;;  %v260_v37 = vmax.f32 %v220_v17, %v241_v36  ;;  %v373_v17 = vld [vmem:[#allocation2 + $0x92] sm:$0xff] }
  0xba   : > { %v243_v38 = vpop.permute.xlu1 %242  ;;  %v1505_v39 = vld [vmem:[#allocation2 + $0x10] sm:$0xff] }
  0xbb   : > { %v310_v40 = vld [vmem:[#allocation2 + $0x11] sm:$0xff]  ;;  %v261_v41 = vmax.f32 %v221_v18, %v243_v38  ;;  %446 = vrot.lane.b32.xlu0 %v1505_v39, %s1318_s8  ;;  %297 = vst.msk [vmem:[#allocation2 + $0x51] sm:$0xff] %vm264_vm0, %v260_v37 }
  0xbc   : > { %384 = vrot.lane.b32.xlu1 %v310_v40, %s1315_s4  ;;  %v245_v42 = vpop.permute.xlu0 %244  ;;  %v318_v45 = vld [vmem:[#allocation2 + $0x12] sm:$0xff] }
  0xbd   : > { %298 = vst.msk [vmem:[#allocation2 + $0x61] sm:$0xff] %vm264_vm0, %v261_v41  ;;  %v262_v43 = vmax.f32 %v222_v23, %v245_v42  ;;  %v312_v49 = vld [vmem:[#allocation2 + $0x31] sm:$0xff] }
  0xbe   : > { %v247_v44 = vpop.permute.xlu1 %246  ;;  %v334_v47 = vld [vmem:[#allocation2 + $0x21] sm:$0xff]  ;;  %v320_v51 = vld [vmem:[#allocation2 + $0x32] sm:$0xff] }
  0xbf   : > { %v263_v46 = vmax.f32 %v223_v24, %v247_v44  ;;  %478 = vrot.lane.b32.xlu0 %v310_v40, %s1319_s17  ;;  %299 = vst.msk [vmem:[#allocation2 + $0x71] sm:$0xff] %vm264_vm0, %v262_v43  ;;  %v1515_v48 = vld [vmem:[#allocation2 + $0x20] sm:$0xff]  ;;  %v1527_v52 = vld [vmem:[#allocation2 + $0x30] sm:$0xff] }
  0xc0   : > { %416 = vrot.lane.b32.xlu1 %v318_v45, %s1317_s7  ;;  %v342_v50 = vld [vmem:[#allocation2 + $0x22] sm:$0xff]  ;;  %v383_v10 = vpop.permute.xlu0 %382 }
  0xc1   : > { %300 = vst.msk [vmem:[#allocation2 + $0x81] sm:$0xff] %vm264_vm0, %v263_v46  ;;  %v1539_v56 = vld [vmem:[#allocation2 + $0x40] sm:$0xff]  ;;  %v630_v33 = vsel %vm264_vm0, %v301_v32, %v383_v10 }
  0xc2   : > { %v313_v61 = vld [vmem:[#allocation2 + $0x41] sm:$0xff]  ;;  %v314_v62 = vld [vmem:[#allocation2 + $0x51] sm:$0xff]  ;;  %v1607_v11 = vpop.permute.xlu1 %556 }
  0xc3   : > { %480 = vrot.lane.b32.xlu0 %v334_v47, %s1319_s17  ;;  %v344_v63 = vld [vmem:[#allocation2 + $0x42] sm:$0xff]  ;;  %v322_v0 = vld [vmem:[#allocation2 + $0x52] sm:$0xff] }
  0xc4   : > { %448 = vrot.lane.b32.xlu1 %v1515_v48, %s1318_s8  ;;  %v1566_v1 = vld [vmem:[#allocation2 + $0x50] sm:$0xff]  ;;  %v1572_v2 = vld [vmem:[#allocation2 + $0x60] sm:$0xff]  ;;  %v415_v12 = vpop.permute.xlu0 %414 }
  0xc5   : > { %v315_v3 = vld [vmem:[#allocation2 + $0x61] sm:$0xff]  ;;  %v639_v36 = vsel %vm638_vm4, %v630_v33, %v415_v12 }
  0xc6   : > { %v316_v4 = vld [vmem:[#allocation2 + $0x71] sm:$0xff]  ;;  %v346_v5 = vld [vmem:[#allocation2 + $0x62] sm:$0xff] }
  0xc7   : > { %388 = vrot.lane.b32.xlu0 %v312_v49, %s1315_s4  ;;  %v324_v6 = vld [vmem:[#allocation2 + $0x72] sm:$0xff] }
  0xc8   : > { %386 = vrot.lane.b32.xlu1 %v334_v47, %s1315_s4  ;;  %v1590_v7 = vld [vmem:[#allocation2 + $0x70] sm:$0xff]  ;;  %v332_v8 = vld [vmem:[#allocation2 + $0x80] sm:$0xff] }
  0xc9   : > { %v340_v9 = vld [vmem:[#allocation2 + $0x81] sm:$0xff] }
  0xca   : > { %v348_v13 = vld [vmem:[#allocation2 + $0x82] sm:$0xff] }
  0xcb   : > { %512 = vrot.lane.b32.xlu0 %v342_v50, %s1320_s19 }
  0xcc   : > { %510 = vrot.lane.b32.xlu1 %v318_v45, %s1320_s19 }
  0xcf   : > { %420 = vrot.lane.b32.xlu0 %v320_v51, %s1317_s7 }
  0xd0   : > { %418 = vrot.lane.b32.xlu1 %v342_v50, %s1317_s7 }
  0xd3   : > { %544 = vrot.lane.b32.xlu0 %v1527_v52, %s1316_s6 }
  0xd4   : > { %542 = vrot.lane.b32.xlu1 %v1515_v48, %s1316_s6 }
  0xd7   : > { %452 = vrot.lane.b32.xlu0 %v1539_v56, %s1318_s8 }
  0xd8   : > { %450 = vrot.lane.b32.xlu1 %v1527_v52, %s1318_s8 }
  0xdb   : > { %576 = vrot.lane.b32.xlu0 %v312_v49, %s1321_s23 }
  0xdc   : > { %574 = vrot.lane.b32.xlu1 %v334_v47, %s1321_s23 }
  0xdf   : > { %390 = vrot.lane.b32.xlu0 %v313_v61, %s1315_s4 }
  0xe0   : > { %482 = vrot.lane.b32.xlu1 %v312_v49, %s1319_s17 }
  0xe3   : > { %514 = vrot.lane.b32.xlu0 %v320_v51, %s1320_s19 }
  0xe4   : > { %606 = vrot.lane.b32.xlu1 %v342_v50, %s1322_s20 }
  0xe7   : > { %392 = vrot.lane.b32.xlu0 %v314_v62, %s1315_s4 }
  0xe8   : > { %484 = vrot.lane.b32.xlu1 %v313_v61, %s1319_s17 }
  0xeb   : > { %516 = vrot.lane.b32.xlu0 %v344_v63, %s1320_s19 }
  0xec   : > { %608 = vrot.lane.b32.xlu1 %v320_v51, %s1322_s20 }
  0xef   : > { %424 = vrot.lane.b32.xlu0 %v322_v0, %s1317_s7 }
  0xf0   : > { %422 = vrot.lane.b32.xlu1 %v344_v63, %s1317_s7 }
  0xf3   : > { %548 = vrot.lane.b32.xlu0 %v1566_v1, %s1316_s6 }
  0xf4   : > { %546 = vrot.lane.b32.xlu1 %v1539_v56, %s1316_s6 }
  0xf7   : > { %456 = vrot.lane.b32.xlu0 %v1572_v2, %s1318_s8 }
  0xf8   : > { %454 = vrot.lane.b32.xlu1 %v1566_v1, %s1318_s8 }
  0xfb   : > { %580 = vrot.lane.b32.xlu0 %v314_v62, %s1321_s23 }
  0xfc   : > { %578 = vrot.lane.b32.xlu1 %v313_v61, %s1321_s23 }
  0xff   : > { %394 = vrot.lane.b32.xlu0 %v315_v3, %s1315_s4 }
 0x100   : > { %486 = vrot.lane.b32.xlu1 %v314_v62, %s1319_s17 }
 0x103   : > { %518 = vrot.lane.b32.xlu0 %v322_v0, %s1320_s19 }
 0x104   : > { %610 = vrot.lane.b32.xlu1 %v344_v63, %s1322_s20 }
 0x107   : > { %396 = vrot.lane.b32.xlu0 %v316_v4, %s1315_s4  ;;  %s1047_s4 = sshll.u32 %s1450_s5, 6 }
 0x108   : > { %488 = vrot.lane.b32.xlu1 %v315_v3, %s1319_s17 }
 0x10b   : > { %520 = vrot.lane.b32.xlu0 %v346_v5, %s1320_s19 }
 0x10c   : > { %612 = vrot.lane.b32.xlu1 %v322_v0, %s1322_s20 }
 0x10f   : > { %428 = vrot.lane.b32.xlu0 %v324_v6, %s1317_s7 }
 0x110   : > { %426 = vrot.lane.b32.xlu1 %v346_v5, %s1317_s7 }
 0x113   : > { %552 = vrot.lane.b32.xlu0 %v1590_v7, %s1316_s6 }
 0x114   : > { %550 = vrot.lane.b32.xlu1 %v1572_v2, %s1316_s6 }
 0x117   : > { %460 = vrot.lane.b32.xlu0 %v332_v8, %s1318_s8 }
 0x118   : > { %458 = vrot.lane.b32.xlu1 %v1590_v7, %s1318_s8 }
 0x11b   : > { %584 = vrot.lane.b32.xlu0 %v316_v4, %s1321_s23 }
 0x11c   : > { %582 = vrot.lane.b32.xlu1 %v315_v3, %s1321_s23 }
 0x11f   : > { %492 = vrot.lane.b32.xlu0 %v340_v9, %s1319_s17 }
 0x120   : > { %490 = vrot.lane.b32.xlu1 %v316_v4, %s1319_s17  ;;  %s1066_s17 = sshll.u32 %s1367_s16, 10 }
 0x121   : > { %s1737_s26 = scalar_lea.hbm %s1823_s2, %s1066_s17 }
 0x123   : > { %616 = vrot.lane.b32.xlu0 %v324_v6, %s1322_s20 }
 0x124   : > { %614 = vrot.lane.b32.xlu1 %v346_v5, %s1322_s20 }
 0x127   : > { %554 = vrot.lane.b32.xlu0 %v332_v8, %s1316_s6  ;;  %s1705_s6 = scalar_lea.vmem [#allocation6], %s1047_s4 }
 0x128   : > { %522 = vrot.lane.b32.xlu1 %v324_v6, %s1320_s19  ;;  %s921_s8 = sshll.u32 %s1705_s6, 4  ;;  %s1732_s8 = int_to_ptr.vmem [resolvable:$true] %s921_s8 }
 0x129   : > { %s1210_s28 = scalar_lea.vmem %s1732_s8, 1024  ;;  %p1217_p8 = scmp.lt.s32.totalorder %s1732_s8, %s1215_s30 }
 0x12a   : > { %p1211_p6 = scmp.ne.s32.totalorder %s1732_s8, %s1210_s28  ;;  %p1218_p10 = scmp.lt.s32.totalorder %s1216_s9, %s1210_s28 }
 0x12b   : > { %586 = vrot.lane.b32.xlu0 %v340_v9, %s1321_s23 }
 0x12c   : > { %524 = vrot.lane.b32.xlu1 %v348_v13, %s1320_s19  ;;  %p1212_p12 = pnand %p1211_p6, %p1831_p11  ;;  %p1219_p0 = por %p1218_p10, %p1217_p8 }
 0x12d   : > { %v447_v16 = vpop.permute.xlu0 %446 }
 0x12e   : > { %v385_v15 = vpop.permute.xlu1 %384  ;;  %v648_v37 = vsel %vm647_vm5, %v639_v36, %v447_v16  ;;  %p1213_p13 = pneg %p1212_p12 }
 0x12f   : > { %618 = vrot.lane.b32.xlu0 %v348_v13, %s1322_s20  ;;  %v631_v44 = vsel %vm264_vm0, %v1505_v39, %v385_v15 }
 0x130   : > { %588 = vrot.lane.b32.xlu1 %v365_v14, %s1321_s23  ;;  %p1220_p2 = pnand %p1219_p0, %p1213_p13 }
 0x131   : > { %v479_v19 = vpop.permute.xlu0 %478 }
 0x132   : > { %v417_v18 = vpop.permute.xlu1 %416  ;;  %v657_v41 = vsel %vm656_vm6, %v648_v37, %v479_v19 }
 0x133   : > { %v640_v49 = vsel %vm638_vm4, %v631_v44, %v417_v18 }
 0x134   : > { %620 = vrot.lane.b32.xlu1 %v373_v17, %s1322_s20 }
 0x135   : > { %v481_v21 = vpop.permute.xlu0 %480 }
 0x136   : > { %v449_v20 = vpop.permute.xlu1 %448 }
 0x137   : > { %v649_v51 = vsel %vm647_vm5, %v640_v49, %v449_v20 }
 0x138   : > { %v658_v55 = vsel %vm656_vm6, %v649_v51, %v481_v21 }
 0x139   : > { %v1614_v23 = vpop.permute.xlu0 %388 }
 0x13a   : > { %v387_v22 = vpop.permute.xlu1 %386 }
 0x13b   : > { %v632_v9 = vsel %vm264_vm0, %v1515_v48, %v387_v22  ;;  %v633_v48 = vsel %vm264_vm0, %v1527_v52, %v1614_v23 }
 0x13d   : > { %v513_v25 = vpop.permute.xlu0 %512 }
 0x13e   : > { %v511_v24 = vpop.permute.xlu1 %510  ;;  %v667_v57 = vsel %vm665_vm7, %v658_v55, %v513_v25 }
 0x13f   : > { %v666_v42 = vsel %vm665_vm7, %v657_v41, %v511_v24 }
 0x141   : > { %v1616_v27 = vpop.permute.xlu0 %420 }
 0x142   : > { %v419_v26 = vpop.permute.xlu1 %418  ;;  %v642_v22 = vsel %vm638_vm4, %v633_v48, %v1616_v27 }
 0x143   : > { %v641_v10 = vsel %vm638_vm4, %v632_v9, %v419_v26 }
 0x145   : > { %v545_v29 = vpop.permute.xlu0 %544 }
 0x146   : > { %v543_v28 = vpop.permute.xlu1 %542  ;;  %v676_v39 = vsel %vm674_vm8, %v667_v57, %v545_v29 }
 0x147   : > { %v675_v43 = vsel %vm674_vm8, %v666_v42, %v543_v28 }
 0x149   : > { %v453_v31 = vpop.permute.xlu0 %452 }
 0x14a   : > { %v451_v30 = vpop.permute.xlu1 %450  ;;  %v651_v24 = vsel %vm647_vm5, %v642_v22, %v453_v31 }
 0x14b   : > { %v650_v12 = vsel %vm647_vm5, %v641_v10, %v451_v30 }
 0x14d   : > { %v577_v35 = vpop.permute.xlu0 %576 }
 0x14e   : > { %v575_v34 = vpop.permute.xlu1 %574  ;;  %v685_v58 = vsel %vm683_vm9, %v676_v39, %v577_v35 }
 0x14f   : > { %v684_v45 = vsel %vm683_vm9, %v675_v43, %v575_v34 }
 0x151   : > { %v1621_v40 = vpop.permute.xlu0 %390 }
 0x152   : > { %v483_v38 = vpop.permute.xlu1 %482  ;;  %v634_v42 = vsel %vm264_vm0, %v1539_v56, %v1621_v40 }
 0x153   : > { %v659_v15 = vsel %vm656_vm6, %v650_v12, %v483_v38 }
 0x155   : > { %v515_v47 = vpop.permute.xlu0 %514 }
 0x156   : > { %v607_v46 = vpop.permute.xlu1 %606  ;;  %v668_v16 = vsel %vm665_vm7, %v659_v15, %v515_v47 }
 0x157   : > { %v693_v50 = vsel %vm692_vm10, %v684_v45, %v607_v46 }
 0x158   : > { %1090 = vmatprep.mubr.msk.f32.mxu0 %vm706_vm11, %v693_v50 }
 0x159   : > { %v393_v54 = vpop.permute.xlu0 %392 }
 0x15a   : > { %v485_v53 = vpop.permute.xlu1 %484  ;;  %v635_v43 = vsel %vm264_vm0, %v1566_v1, %v393_v54 }
 0x15b   : > { %v660_v28 = vsel %vm656_vm6, %v651_v24, %v485_v53 }
 0x15d   : > { %v517_v60 = vpop.permute.xlu0 %516 }
 0x15e   : > { %v609_v59 = vpop.permute.xlu1 %608  ;;  %v669_v29 = vsel %vm665_vm7, %v660_v28, %v517_v60 }
 0x15f   : > { %v694_v61 = vsel %vm692_vm10, %v685_v58, %v609_v59 }
 0x160   : > { %1091 = vmatmul.mubr.msk.f32.vlgmr.msra.gmra.mrb[0].mxu0 %vm706_vm11, %v694_v61 }
 0x161   : > { %v425_v63 = vpop.permute.xlu0 %424 }
 0x162   : > { %v423_v62 = vpop.permute.xlu1 %422  ;;  %v644_v45 = vsel %vm638_vm4, %v635_v43, %v425_v63 }
 0x163   : > { %v643_v44 = vsel %vm638_vm4, %v634_v42, %v423_v62 }
 0x165   : > { %v549_v3 = vpop.permute.xlu0 %548 }
 0x166   : > { %v547_v0 = vpop.permute.xlu1 %546  ;;  %v678_v30 = vsel %vm674_vm8, %v669_v29, %v549_v3 }
 0x167   : > { %v677_v17 = vsel %vm674_vm8, %v668_v16, %v547_v0 }
 0x169   : > { %v457_v5 = vpop.permute.xlu0 %456 }
 0x16a   : > { %v455_v4 = vpop.permute.xlu1 %454  ;;  %v653_v47 = vsel %vm647_vm5, %v644_v45, %v457_v5 }
 0x16b   : > { %v652_v46 = vsel %vm647_vm5, %v643_v44, %v455_v4 }
 0x16d   : > { %v581_v8 = vpop.permute.xlu0 %580 }
 0x16e   : > { %v579_v6 = vpop.permute.xlu1 %578  ;;  %v687_v32 = vsel %vm683_vm9, %v678_v30, %v581_v8 }
 0x16f   : > { %v686_v18 = vsel %vm683_vm9, %v677_v17, %v579_v6 }
 0x171   : > { %v395_v14 = vpop.permute.xlu0 %394 }
 0x172   : > { %v487_v13 = vpop.permute.xlu1 %486  ;;  %v636_v61 = vsel %vm264_vm0, %v1572_v2, %v395_v14 }
 0x173   : > { %v661_v51 = vsel %vm656_vm6, %v652_v46, %v487_v13 }
 0x175   : > { %v519_v20 = vpop.permute.xlu0 %518 }
 0x176   : > { %v611_v19 = vpop.permute.xlu1 %610  ;;  %v670_v55 = vsel %vm665_vm7, %v661_v51, %v519_v20 }
 0x177   : > { %v695_v21 = vsel %vm692_vm10, %v686_v18, %v611_v19 }
 0x178   : > { %1093 = vmatprep.mubr.msk.f32.mxu0 %vm706_vm11, %v695_v21 }
 0x179   : > { %v397_v26 = vpop.permute.xlu0 %396 }
 0x17a   : > { %v489_v25 = vpop.permute.xlu1 %488  ;;  %v637_v5 = vsel %vm264_vm0, %v1590_v7, %v397_v26 }
 0x17b   : > { %v662_v53 = vsel %vm656_vm6, %v653_v47, %v489_v25 }
 0x17d   : > { %v521_v34 = vpop.permute.xlu0 %520 }
 0x17e   : > { %v613_v33 = vpop.permute.xlu1 %612  ;;  %v671_v56 = vsel %vm665_vm7, %v662_v53, %v521_v34 }
 0x17f   : > { %v696_v52 = vsel %vm692_vm10, %v687_v32, %v613_v33 }
 0x180   : > { %1094 = vmatmul.mubr.msk.f32.gmra.mrb[2].mxu0 %vm706_vm11, %v696_v52 }
 0x181   : > { %v429_v27 = vpop.permute.xlu0 %428 }
 0x182   : > { %v427_v23 = vpop.permute.xlu1 %426  ;;  %v646_v10 = vsel %vm638_vm4, %v637_v5, %v429_v27 }
 0x183   : > { %v645_v0 = vsel %vm638_vm4, %v636_v61, %v427_v23 }
 0x185   : > { %v553_v31 = vpop.permute.xlu0 %552 }
 0x186   : > { %v551_v35 = vpop.permute.xlu1 %550  ;;  %v680_v40 = vsel %vm674_vm8, %v671_v56, %v553_v31 }
 0x187   : > { %v679_v1 = vsel %vm674_vm8, %v670_v55, %v551_v35 }
 0x189   : > { %v461_v37 = vpop.permute.xlu0 %460 }
 0x18a   : > { %v459_v36 = vpop.permute.xlu1 %458  ;;  %v655_v2 = vsel %vm647_vm5, %v646_v10, %v461_v37 }
 0x18b   : > { %v654_v3 = vsel %vm647_vm5, %v645_v0, %v459_v36 }
 0x18d   : > { %v585_v41 = vpop.permute.xlu0 %584 }
 0x18e   : > { %v583_v38 = vpop.permute.xlu1 %582  ;;  %v689_v57 = vsel %vm683_vm9, %v680_v40, %v585_v41 }
 0x18f   : > { %v688_v54 = vsel %vm683_vm9, %v679_v1, %v583_v38 }
 0x191   : > { %v493_v50 = vpop.permute.xlu0 %492 }
 0x192   : > { %v491_v49 = vpop.permute.xlu1 %490  ;;  %v664_v12 = vsel %vm656_vm6, %v655_v2, %v493_v50 }
 0x193   : > { %v663_v4 = vsel %vm656_vm6, %v654_v3, %v491_v49 }
 0x195   : > { %v617_v58 = vpop.permute.xlu0 %616 }
 0x196   : > { %v615_v39 = vpop.permute.xlu1 %614  ;;  %v698_v59 = vsel %vm692_vm10, %v689_v57, %v617_v58 }
 0x197   : > { %v697_v60 = vsel %vm692_vm10, %v688_v54, %v615_v39 }
 0x198   : > { %1096 = vmatprep.mubr.msk.f32.mxu1 %vm706_vm11, %v697_v60 }
 0x199   : > { %1097 = vmatmul.mubr.msk.f32.vlgmr.msra.gmra.mrb[0].mxu1 %vm706_vm11, %v698_v59  ;;  %v555_v63 = vpop.permute.xlu0 %554 }
 0x19a   : > { %v523_v62 = vpop.permute.xlu1 %522 }
 0x19b   : > { %v672_v6 = vsel %vm665_vm7, %v663_v4, %v523_v62 }
 0x19c   : > { %v681_v13 = vsel %vm674_vm8, %v672_v6, %v555_v63 }
 0x19d   : > { %v587_v9 = vpop.permute.xlu0 %586 }
 0x19e   : > { %v525_v8 = vpop.permute.xlu1 %524  ;;  %v690_v15 = vsel %vm683_vm9, %v681_v13, %v587_v9 }
 0x19f   : > { %v673_v14 = vsel %vm665_vm7, %v664_v12, %v525_v8 }
 0x1a0   : > { %v682_v18 = vsel %vm674_vm8, %v673_v14, %v1607_v11 }
 0x1a1   : > { %v619_v17 = vpop.permute.xlu0 %618 }
 0x1a2   : > { %v589_v16 = vpop.permute.xlu1 %588  ;;  %v699_v7 = vsel %vm692_vm10, %v690_v15, %v619_v17 }
 0x1a3   : > { %1099 = vmatprep.mubr.msk.f32.mxu1 %vm706_vm11, %v699_v7  ;;  %v691_v19 = vsel %vm683_vm9, %v682_v18, %v589_v16 }
 0x1a6   : > { %v621_v20 = vpop.permute.xlu1 %620 }
 0x1a7   : > { %v700_v21 = vsel %vm692_vm10, %v691_v19, %v621_v20 }
 0x1a8   : > { %1100 = vmatmul.mubr.msk.f32.gmra.mrb[2].mxu1 %vm706_vm11, %v700_v21 }
 0x233   : > { %v1092_v48 = vpop.f32.mrb[0].mxu0 }
 0x234   : > { %v841_v22 = vsel %vm638_vm4, %v1092_v48, 0.0  ;;  %v862_v24 = vmul.f32 %v1092_v48, %v1092_v48  ;;  %895 = vst.msk [vmem:[%s1705_s6 + $0x8] sm:$0xff] %vm638_vm4, %v1092_v48  ;;  %v801_v11 = vpop.f32.mrb[1].mxu0 }
 0x235   : > { %v840_v25 = vsel %vm638_vm4, %v801_v11, 0.0  ;;  %v861_v26 = vmul.f32 %v801_v11, %v801_v11  ;;  %894 = vst.msk [vmem:[%s1705_s6] sm:$0xff] %vm638_vm4, %v801_v11 }
 0x236   : > { %v870_v28 = vsel %vm638_vm4, %v862_v24, 0.0  ;;  %v842_v29 = vadd.f32 %v841_v22, %v840_v25 }
 0x237   : > { %v869_v30 = vsel %vm638_vm4, %v861_v26, 0.0 }
 0x238   : > { %v871_v32 = vadd.f32 %v870_v28, %v869_v30 }
 0x253   : > { %v1095_v33 = vpop.f32.mrb[2].mxu0 }
 0x254   : > { %897 = vst.msk [vmem:[%s1705_s6 + $0x18] sm:$0xff] %vm638_vm4, %v1095_v33  ;;  %v811_v34 = vpop.f32.mrb[3].mxu0  ;;  %v864_v52 = vmul.f32 %v1095_v33, %v1095_v33  ;;  %v845_v31 = vsel %vm638_vm4, %v1095_v33, 0.0 }
 0x255   : > { %v843_v23 = vsel %vm638_vm4, %v811_v34, 0.0  ;;  %v863_v27 = vmul.f32 %v811_v34, %v811_v34  ;;  %896 = vst.msk [vmem:[%s1705_s6 + $0x10] sm:$0xff] %vm638_vm4, %v811_v34 }
 0x256   : > { %v844_v35 = vadd.f32 %v843_v23, %v842_v29  ;;  %v874_v41 = vsel %vm638_vm4, %v864_v52, 0.0 }
 0x257   : > { %v872_v36 = vsel %vm638_vm4, %v863_v27, 0.0 }
 0x258   : > { %v846_v37 = vadd.f32 %v845_v31, %v844_v35  ;;  %v873_v38 = vadd.f32 %v872_v36, %v871_v32 }
 0x25a   : > { %v875_v42 = vadd.f32 %v874_v41, %v873_v38 }
 0x26c   : > { %v1098_v43 = vpop.f32.mrb[0].mxu1 }
 0x26d   : > { %899 = vst.msk [vmem:[%s1705_s6 + $0x28] sm:$0xff] %vm638_vm4, %v1098_v43  ;;  %v821_v44 = vpop.f32.mrb[1].mxu1  ;;  %v866_v45 = vmul.f32 %v1098_v43, %v1098_v43  ;;  %v849_v50 = vsel %vm638_vm4, %v1098_v43, 0.0 }
 0x26e   : > { %v847_v46 = vsel %vm638_vm4, %v821_v44, 0.0  ;;  %v865_v47 = vmul.f32 %v821_v44, %v821_v44  ;;  %898 = vst.msk [vmem:[%s1705_s6 + $0x20] sm:$0xff] %vm638_vm4, %v821_v44 }
 0x26f   : > { %v848_v49 = vadd.f32 %v847_v46, %v846_v37  ;;  %v878_v56 = vsel %vm638_vm4, %v866_v45, 0.0 }
 0x270   : > { %v876_v51 = vsel %vm638_vm4, %v865_v47, 0.0 }
 0x271   : > { %v877_v53 = vadd.f32 %v876_v51, %v875_v42  ;;  %v850_v55 = vadd.f32 %v849_v50, %v848_v49 }
 0x273   : > { %v879_v1 = vadd.f32 %v878_v56, %v877_v53 }
 0x27b   : > { %v1101_v40 = vpop.f32.mrb[2].mxu1 }
 0x27c   : > { %901 = vst.msk [vmem:[%s1705_s6 + $0x38] sm:$0xff] %vm638_vm4, %v1101_v40  ;;  %v831_v54 = vpop.f32.mrb[3].mxu1  ;;  %v868_v57 = vmul.f32 %v1101_v40, %v1101_v40 }
 0x27d   : > { %v851_v39 = vsel %vm638_vm4, %v831_v54, 0.0  ;;  %v867_v58 = vmul.f32 %v831_v54, %v831_v54  ;;  %900 = vst.msk [vmem:[%s1705_s6 + $0x30] sm:$0xff] %vm638_vm4, %v831_v54 }
 0x27e   : > { %v852_v59 = vadd.f32 %v851_v39, %v850_v55 }
 0x27f   : > { %1223 = shalt.err (!%p1220_p2)
}
 0x280   : > { %s1224_s10 = scalar_lea.hbm %s1737_s26, 1024  ;;  %s1228_s20 = scalar_lea.hbm %s1823_s2, 2048 }
 0x281   : > { %p1225_p4 = scmp.ne.s32.totalorder %s1737_s26, %s1224_s10  ;;  %p1229_p9 = scmp.lt.u32.totalorder %s1737_s26, %s1823_s2 }
 0x282   : > { %p1230_p1 = scmp.lt.u32.totalorder %s1228_s20, %s1224_s10  ;;  %p1232_p6 = scmp.lt.u32.totalorder %s1224_s10, %s1737_s26 }
 0x283   : > { %p1226_p5 = pnand %p1225_p4, %p1831_p11 }
 0x284   : > { %p1231_p3 = por %p1230_p1, %p1229_p9 }
 0x285   : > { %p1227_p7 = pneg %p1226_p5 }
 0x286   : > { %p1233_p12 = por %p1232_p6, %p1231_p3 }
 0x288   : > { %p1234_p13 = pnand %p1233_p12, %p1227_p7 }
 0x28a   : > { %1237 = shalt.err (!%p1234_p13)
}
 0x28b   : > { %s1324_s17 = smov 128   ;;  %v853_v60 = vsel %vm638_vm4, %v1101_v40, 0.0  ;;  %v880_v61 = vsel %vm638_vm4, %v867_v58, 0.0  ;;  %v882_v0 = vsel %vm638_vm4, %v868_v57, 0.0  ;;  %s1048_s19 = sshll.u32 %s1450_s5, 1  ;;  %vm890_vm12 = vcmask 1040384  }
 0x28c   : > { %1118 = dma.vmem_to_hbm [thread:$0]  (%p1831_p11), %s1732_s8, 1024, %s1737_s26, %s903_s27, %s1324_s17, %s1324_s17, %s1317_s7   ;;  %v854_v62 = vadd.f32 %v853_v60, %v852_v59  ;;  %v881_v63 = vadd.f32 %v880_v61, %v879_v1  ;;  %vm892_vm13 = vcmask 58368  }
 0x28d   : > { %s1062_s7 = sshll.u32 %s1367_s16, 5  ;;  %s199_s8 = scalar_lea.vmem [#allocation7], %s1048_s19 }
 0x28e   : > { %v855_v3 = vrot.slane %v854_v62, 4  ;;  %v883_v4 = vadd.f32 %v882_v0, %v881_v63  ;;  %s937_s22 = sshll.u32 %s199_s8, 4  ;;  %s1777_s28 = scalar_lea.hbm %s1824_s3, %s1062_s7  ;;  %s1779_s22 = int_to_ptr.vmem [resolvable:$true] %s937_s22 }
 0x28f   : > { %s908_s29 = scalar_lea.sflag [#allocation8], %s1450_s5  ;;  %s1238_s16 = scalar_lea.vmem %s1779_s22, 32 }
 0x290   : > { %v856_v5 = vadd.f32 %v855_v3, %v854_v62  ;;  %v884_v6 = vrot.slane %v883_v4, 4  ;;  %p1239_p8 = scmp.ne.s32.totalorder %s1779_s22, %s1238_s16  ;;  %s1325_s30 = smov [#allocation7]  }
 0x291   : > { %s1242_s9 = sshll.u32 %s1325_s30, 4  ;;  %s1243_s9 = int_to_ptr.vmem [resolvable:$false] %s1242_s9 }
 0x292   : > { %v857_v8 = vrot.slane %v856_v5, 2  ;;  %v885_v9 = vadd.f32 %v884_v6, %v883_v4  ;;  %p1240_p10 = pnand %p1239_p8, %p1831_p11  ;;  %s1244_s10 = scalar_lea.vmem %s1243_s9, 64 }
 0x293   : > { %p1245_p2 = scmp.lt.s32.totalorder %s1779_s22, %s1243_s9  ;;  %p1246_p4 = scmp.lt.s32.totalorder %s1244_s10, %s1238_s16 }
 0x294   : > { %v858_v10 = vadd.f32 %v857_v8, %v856_v5  ;;  %v886_v2 = vrot.slane %v885_v9, 2  ;;  %p1241_p0 = pneg %p1240_p10 }
 0x295   : > { %p1247_p5 = por %p1246_p4, %p1245_p2 }
 0x296   : > { %v859_v12 = vrot.slane %v858_v10, 1  ;;  %v887_v13 = vadd.f32 %v886_v2, %v885_v9 }
 0x297   : > { %p1248_p7 = pnand %p1247_p5, %p1241_p0 }
 0x298   : > { %v888_v14 = vrot.slane %v887_v13, 1  ;;  %v860_v15 = vadd.f32 %v859_v12, %v858_v10 }
 0x29a   : > { %v889_v16 = vadd.f32 %v888_v14, %v887_v13 }
 0x29c   : > { %v891_v17 = vsel %vm890_vm12, %v860_v15, %v889_v16 }
 0x29d   : > { %893 = vst.msk [vmem:[%s199_s8] sm:$0x3] %vm892_vm13, %v891_v17 }
 0x29e   : > { %1251 = shalt.err (!%p1248_p7)
}
 0x29f   : > { %s1252_s5 = scalar_lea.hbm %s1777_s28, 32  ;;  %s1256_s20 = scalar_lea.hbm %s1824_s3, 64 }
 0x2a0   : > { %p1253_p9 = scmp.ne.s32.totalorder %s1777_s28, %s1252_s5  ;;  %p1257_p6 = scmp.lt.u32.totalorder %s1777_s28, %s1824_s3 }
 0x2a1   : > { %p1258_p12 = scmp.lt.u32.totalorder %s1256_s20, %s1252_s5  ;;  %p1260_p8 = scmp.lt.u32.totalorder %s1252_s5, %s1777_s28 }
 0x2a2   : > { %p1254_p1 = pnand %p1253_p9, %p1831_p11 }
 0x2a3   : > { %p1259_p13 = por %p1258_p12, %p1257_p6 }
 0x2a4   : > { %p1255_p3 = pneg %p1254_p1 }
 0x2a5   : > { %p1261_p10 = por %p1260_p8, %p1259_p13 }
 0x2a7   : > { %p1262_p0 = pnand %p1261_p10, %p1255_p3 }
 0x2a9   : > { %1265 = shalt.err (!%p1262_p0)
}
 0x2aa   : > { %1119 = dma.vmem_to_hbm [thread:$0]  (%p1831_p11), %s1779_s22, 32, %s1777_s28, %s908_s29  }
 0x2ab PF: > { %s949_s17 = sand.u32 1, %s1296_s12   ;;  %p1832_p2 = scmp.ne.s32.totalorder %s1829_s25, 0 }
 0x2ac   : > { %p1833_p4 = scmp.ge.s32.totalorder %s1308_s15, 2  ;;  %s950_s19 = scalar_lea.sflag [#allocation5], %s949_s17 }
 0x2ae   : > { %p1127_p5 = pnand %p1833_p4, %p1832_p2 }
 0x2b0   : > { %1287 = dma.done.wait (!%p1127_p5), %s950_s19, 1024  }
 0x2b1   : > { %1289 = vsyncadd (!%p1127_p5), %s950_s19, 4294966272  ;;  %s959_s7 = scalar_lea.sflag [#allocation8], %s949_s17 }
 0x2b2   : > { %1291 = dma.done.wait (!%p1127_p5), %s959_s7, 32  }
 0x2b3   : > { %1293 = vsyncadd (!%p1127_p5), %s959_s7, 4294967264  ;;  %p20_p11 = scmp.ge.s32.totalorder %s1371_s18, 4   ;;  %s1834_s12 = smov %s1300_s13 }
 0x2b4   : > { %s1835_s13 = smov %s1304_s14  ;;  %s1836_s14 = smov %s1383_s21 }
 0x2b5   : > { %s1837_s15 = smov %s1371_s18  ;;  %22 = sbr.rel (!%p20_p11) target bundleno = 7 (0x7), region = 93 }
 0x2bc   :  { %964 = vsyncpa [#allocation4], 1 }
 0x2bd   :  { %966 = vsyncpa [#allocation4 + $0x1], 1 }
 0x2be   :  { %967 = vsyncpa [#allocation5], 1 }
 0x2bf   :  { %969 = vsyncpa [#allocation5 + $0x1], 1 }
 0x2c0   :  { %970 = vsyncpa [#allocation8], 1 }
 0x2c1   :  { %972 = vsyncpa [#allocation8 + $0x1], 1 }

</bundles_post_ra>
